<compile_context>
chip_gen: v5e
topology: v5e:2x2
jax: 0.10.0
libtpu: 0.0.40
codegen_flags: <defaults>
</compile_context>

<pallas_src>
import functools

import numpy as np
import jax
import jax.numpy as jnp
from jax.experimental import pallas as pl
from jax.experimental.pallas import tpu as pltpu

EXPANSION = 4
BN_EPS = 1e-5


@functools.lru_cache(maxsize=1)
def _vmem_limit_bytes():
    """Per-generation scoped VMEM limit (~half of physical, floor 32 MiB)."""
    try:
        cap = int(getattr(pltpu.get_tpu_info(), "vmem_capacity_bytes", 0) or 0)
    except Exception:
        cap = 0
    if cap <= 0:
        cap = 128 << 20
    return int(min(max(cap // 2, 32 << 20), 96 << 20))


def _fold_bn(gamma, beta, mean, var, eps=BN_EPS):
    scale = gamma / jnp.sqrt(var + eps)
    bias = beta - mean * scale
    return scale.astype(jnp.float32), bias.astype(jnp.float32)


# --------------------- tiled 1x1 conv (+folded BN bias, optional ReLU) ---------------------
# A 1x1 conv over NHWC is a matmul over the channel axis.  The (M, C) slab is
# tiled along M; weights / bias stay resident across the grid.

def _pointwise_kernel(x_ref, w_ref, b_ref, o_ref, *, relu):
    acc = jnp.dot(x_ref[...], w_ref[...], preferred_element_type=jnp.float32)
    out = acc + b_ref[...]
    if relu:
        out = jnp.maximum(out, 0.0)
    o_ref[...] = out.astype(o_ref.dtype)


def conv1x1_bias(x2d, w, bias, *, relu, out_dtype, block_m=512):
    m, c_in = x2d.shape
    c_out = w.shape[1]
    bm = min(block_m, m)
    assert bm == m or bm % 8 == 0
    grid_m = pl.cdiv(m, bm)
    return pl.pallas_call(
        functools.partial(_pointwise_kernel, relu=relu),
        out_shape=jax.ShapeDtypeStruct((m, c_out), out_dtype),
        grid=(grid_m,),
        in_specs=[
            pl.BlockSpec((bm, c_in), lambda i: (i, 0)),
            pl.BlockSpec((c_in, c_out), lambda i: (0, 0)),
            pl.BlockSpec((1, c_out), lambda i: (0, 0)),
        ],
        out_specs=pl.BlockSpec((bm, c_out), lambda i: (i, 0)),
        compiler_params=pltpu.CompilerParams(
            dimension_semantics=("parallel",),
            vmem_limit_bytes=_vmem_limit_bytes()),
    )(x2d, w, bias.reshape(1, c_out).astype(jnp.float32))


# --- fused: 3x3 conv (pad=1, stride s) + BN2 + ReLU + 1x1 conv + BN3 + shortcut + ReLU ---
# Grid = (batch, row_block).  The (phase-split) padded conv1 output for one
# image stays resident in VMEM; each grid step computes `rows` output rows:
# three K-folded (rows*Wout, 3*Cmid) @ (3*Cmid, Cmid) matmuls for the 3x3 conv,
# a (rows*Wout, Cmid) @ (Cmid, Cout) matmul for conv3, and the shortcut
# (projection 1x1 matmul or identity add) — all without touching HBM between.

def _fused_kernel(x_ref, w2_ref, b2_ref, w3_ref, b3_ref, xs_ref, *rest,
                  stride, rows, w_out, has_proj):
    if has_proj:
        wsc_ref, bsc_ref, o_ref = rest
    else:
        (o_ref,) = rest

    j = pl.program_id(1)
    base = j * rows
    c_mid = w2_ref.shape[2]
    c_out = o_ref.shape[-1]

    # ---- conv2 (3x3): K-folded taps, phase-plane reads for stride 2 ----
    acc2 = None
    for kh in range(3):
        taps = []
        for kw in range(3):
            if stride == 1:
                tap = x_ref[0, 0, pl.ds(base + kh, rows), pl.ds(kw, w_out), :]
            else:
                p = (kh % 2) * stride + (kw % 2)
                tap = x_ref[p, 0, pl.ds(base + kh // 2, rows),
                            pl.ds(kw // 2, w_out), :]
            taps.append(tap)
        lhs = jnp.concatenate(taps, axis=-1).reshape(rows * w_out, 3 * c_mid)
        d = jnp.dot(lhs, w2_ref[kh], preferred_element_type=jnp.float32)
        acc2 = d if acc2 is None else acc2 + d

    h2 = jnp.maximum(acc2 + b2_ref[...], 0.0)                  # f32 epilogue

    # ---- conv3 (1x1) ----
    acc3 = jnp.dot(h2.astype(w3_ref.dtype), w3_ref[...],
                   preferred_element_type=jnp.float32)

    # ---- shortcut (projection 1x1 conv + BN, or identity), fused ----
    xs = xs_ref[0]                                             # (rows*s, Ws, Cin)
    if stride > 1:
        xs = jax.lax.slice(xs, (0, 0, 0),
                           (rows * stride, (w_out - 1) * stride + 1,
                            xs.shape[-1]),
                           (stride, stride, 1))                # (rows, Wout, Cin)
    xs2 = xs.reshape(rows * w_out, xs.shape[-1])
    if has_proj:
        res = jnp.dot(xs2, wsc_ref[...],
                      preferred_element_type=jnp.float32) + bsc_ref[...]
    else:
        res = xs2.astype(jnp.float32)

    out = jnp.maximum(acc3 + b3_ref[...] + res, 0.0)
    o_ref[...] = out.reshape(1, rows, w_out, c_out).astype(o_ref.dtype)


def _pick_rows(h_out, w_out, target_m=512):
    """Largest divisor of h_out with rows*w_out <= target_m (MXU M fill)."""
    best = 1
    cap = max(target_m, w_out)
    for r in range(1, h_out + 1):
        if h_out % r == 0 and r * w_out <= cap:
            best = r
    return best


def fused_conv2_conv3_shortcut(x1_nhwc, w2, b2, w3, b3, xs, w_sc, b_sc, *,
                               stride, out_dtype):
    n, h, w, c_mid = x1_nhwc.shape
    c_out = w3.shape[1]
    h_out = (h - 1) // stride + 1
    w_out = (w - 1) // stride + 1
    rows = _pick_rows(h_out, w_out)
    has_proj = w_sc is not None

    # Padded conv2 input; pad so every tap window (incl. the stride-2 phase
    # planes) is in bounds, then split into stride*stride phase planes so that
    # each tap is a contiguous window (no strided gathers inside the kernel).
    hp_tot = h_out * stride + 2
    wp_tot = w_out * stride + 2
    xp = jnp.pad(x1_nhwc, ((0, 0), (1, hp_tot - h - 1), (1, wp_tot - w - 1),
                           (0, 0)))
    if stride == 1:
        x_planes = xp[None]                                     # (1,n,Hp,Wp,C)
    else:
        x_planes = jnp.stack(
            [xp[:, r::stride, c::stride, :]
             for r in range(stride) for c in range(stride)], axis=0)
    n_planes, hp2, wp2 = x_planes.shape[0], x_planes.shape[2], x_planes.shape[3]

    # Shortcut input: original x (compute dtype), row-blocked; pad H so the
    # row-block grid covers it exactly (only needed for odd H with stride 2).
    pad_h_s = h_out * stride - xs.shape[1]
    if pad_h_s > 0:
        xs = jnp.pad(xs, ((0, 0), (0, pad_h_s), (0, 0), (0, 0)))
    ws_dim, c_in = xs.shape[2], xs.shape[3]

    w2k = w2.reshape(3, 3 * c_mid, c_mid)                       # K-folded taps

    kernel = functools.partial(_fused_kernel, stride=stride, rows=rows,
                               w_out=w_out, has_proj=has_proj)
    in_specs = [
        pl.BlockSpec((n_planes, 1, hp2, wp2, c_mid),
                     lambda i, j: (0, i, 0, 0, 0)),
        pl.BlockSpec((3, 3 * c_mid, c_mid), lambda i, j: (0, 0, 0)),
        pl.BlockSpec((1, c_mid), lambda i, j: (0, 0)),
        pl.BlockSpec((c_mid, c_out), lambda i, j: (0, 0)),
        pl.BlockSpec((1, c_out), lambda i, j: (0, 0)),
        pl.BlockSpec((1, rows * stride, ws_dim, c_in),
                     lambda i, j: (i, j, 0, 0)),
    ]
    args = [x_planes, w2k, b2.reshape(1, c_mid).astype(jnp.float32),
            w3, b3.reshape(1, c_out).astype(jnp.float32), xs]
    if has_proj:
        in_specs += [pl.BlockSpec((c_in, c_out), lambda i, j: (0, 0)),
                     pl.BlockSpec((1, c_out), lambda i, j: (0, 0))]
        args += [w_sc, b_sc.reshape(1, c_out).astype(jnp.float32)]

    return pl.pallas_call(
        kernel,
        out_shape=jax.ShapeDtypeStruct((n, h_out, w_out, c_out), out_dtype),
        grid=(n, h_out // rows),
        in_specs=in_specs,
        out_specs=pl.BlockSpec((1, rows, w_out, c_out),
                               lambda i, j: (i, j, 0, 0)),
        compiler_params=pltpu.CompilerParams(
            # Batch is the core-sharded axis; the row axis reuses the resident
            # image block, so it must not be split across TensorCores.
            dimension_semantics=("parallel", "arbitrary"),
            vmem_limit_bytes=_vmem_limit_bytes()),
    )(*args)


# ------------------------- parameters & module forward -------------------------

def init_bottleneck_params(key, in_planes, planes, stride=1):
    ks = jax.random.split(key, 8)

    def conv_w(k, shape):
        fan_in = int(np.prod(shape[:-1]))
        return (jax.random.normal(k, shape, jnp.float32) /
                np.sqrt(fan_in)).astype(jnp.float32)

    def bn_p(k, c):
        k1, k2, k3, k4 = jax.random.split(k, 4)
        gamma = 1.0 + 0.1 * jax.random.normal(k1, (c,), jnp.float32)
        beta = 0.1 * jax.random.normal(k2, (c,), jnp.float32)
        mean = 0.1 * jax.random.normal(k3, (c,), jnp.float32)
        var = 0.5 + jax.random.uniform(k4, (c,), jnp.float32)
        return (gamma, beta, mean, var)

    out_planes = EXPANSION * planes
    params = {
        "w1": conv_w(ks[0], (in_planes, planes)),        # 1x1 conv as (Cin, Cout)
        "bn1": bn_p(ks[1], planes),
        "w2": conv_w(ks[2], (3, 3, planes, planes)),     # HWIO
        "bn2": bn_p(ks[3], planes),
        "w3": conv_w(ks[4], (planes, out_planes)),
        "bn3": bn_p(ks[5], out_planes),
    }
    if stride != 1 or in_planes != out_planes:
        params["w_sc"] = conv_w(ks[6], (in_planes, out_planes))
        params["bn_sc"] = bn_p(ks[7], out_planes)
    return params


def bottleneck_forward(params, x_nchw, *, stride=1,
                       compute_dtype=jnp.bfloat16, block_m=512,
                       out_dtype=None):
    if out_dtype is None:
        out_dtype = compute_dtype        # halves writeback of the block output
    x = jnp.transpose(x_nchw, (0, 2, 3, 1)).astype(jnp.float32)   # NCHW -> NHWC
    n, h, w, c_in = x.shape
    planes = params["w1"].shape[1]
    out_planes = params["w3"].shape[1]

    # Fold BN scale into the conv weights (f32), then cast to the MXU dtype.
    s1, b1 = _fold_bn(*params["bn1"])
    w1 = (params["w1"] * s1[None, :]).astype(compute_dtype)
    s2, b2 = _fold_bn(*params["bn2"])
    w2 = (params["w2"] * s2[None, None, None, :]).astype(compute_dtype)
    s3, b3 = _fold_bn(*params["bn3"])
    w3 = (params["w3"] * s3[None, :]).astype(compute_dtype)
    if "w_sc" in params:
        s_sc, b_sc = _fold_bn(*params["bn_sc"])
        w_sc = (params["w_sc"] * s_sc[None, :]).astype(compute_dtype)
    else:
        assert stride == 1 and c_in == out_planes, "identity shortcut shape"
        w_sc, b_sc = None, None

    xc = x.astype(compute_dtype)

    # conv1 (1x1) + BN1 + ReLU, M-tiled pipelined matmul.
    out1 = conv1x1_bias(xc.reshape(n * h * w, c_in), w1, b1, relu=True,
                        out_dtype=compute_dtype, block_m=block_m)
    out1 = out1.reshape(n, h, w, planes)

    # conv2 (3x3) + BN2 + ReLU fused with conv3 (1x1) + BN3 + shortcut + ReLU.
    out = fused_conv2_conv3_shortcut(out1, w2, b2, w3, b3, xc, w_sc, b_sc,
                                     stride=stride, out_dtype=out_dtype)
    return jnp.transpose(out, (0, 3, 1, 2))                      # NHWC -> NCHW


# ------------------------- pure-JAX reference for verification -------------------------
# Mirrors the kernel's compute-dtype cast points so the comparison isolates
# accumulation-order differences only.

def bottleneck_reference(params, x_nchw, *, stride=1,
                         compute_dtype=jnp.bfloat16):
    hi = jax.lax.Precision.HIGHEST
    x = jnp.transpose(x_nchw, (0, 2, 3, 1)).astype(jnp.float32)

    s1, b1 = _fold_bn(*params["bn1"])
    w1 = (params["w1"] * s1[None, :]).astype(compute_dtype)
    s2, b2 = _fold_bn(*params["bn2"])
    w2 = (params["w2"] * s2[None, None, None, :]).astype(compute_dtype)
    s3, b3 = _fold_bn(*params["bn3"])
    w3 = (params["w3"] * s3[None, :]).astype(compute_dtype)
    xc = x.astype(compute_dtype)

    h1 = jnp.einsum("nhwc,cd->nhwd", xc, w1, precision=hi,
                    preferred_element_type=jnp.float32) + b1
    h1 = jax.nn.relu(h1).astype(compute_dtype)

    h2 = jax.lax.conv_general_dilated(
        h1, w2, (stride, stride), [(1, 1), (1, 1)],
        dimension_numbers=("NHWC", "HWIO", "NHWC"),
        precision=hi, preferred_element_type=jnp.float32)
    h2 = jax.nn.relu(h2 + b2)

    h3 = jnp.einsum("nhwc,cd->nhwd", h2.astype(compute_dtype), w3,
                    precision=hi, preferred_element_type=jnp.float32) + b3

    x_s = xc[:, ::stride, ::stride, :]
    if "w_sc" in params:
        s_sc, b_sc = _fold_bn(*params["bn_sc"])
        w_sc = (params["w_sc"] * s_sc[None, :]).astype(compute_dtype)
        sc = jnp.einsum("nhwc,cd->nhwd", x_s, w_sc, precision=hi,
                        preferred_element_type=jnp.float32) + b_sc
    else:
        sc = x_s.astype(jnp.float32)

    out = jax.nn.relu(h3 + sc)
    return jnp.transpose(out, (0, 3, 1, 2))


if __name__ == "__main__":
    key = jax.random.PRNGKey(0)

    # (in_planes, planes, stride, spatial, [(compute_dtype, tol), ...])
    configs = [
        (4, 4, 1, 16, [(jnp.float32, 1e-3), (jnp.bfloat16, 2e-2)]),  # conv shortcut, stride 1
        (8, 4, 2, 16, [(jnp.bfloat16, 2e-2)]),                       # conv shortcut, stride 2
        (16, 4, 1, 16, [(jnp.bfloat16, 2e-2)]),                      # identity shortcut
    ]

    for in_planes, planes, stride, hw, dtypes in configs:
        key, k_param, k_x = jax.random.split(key, 3)
        x = jax.random.normal(k_x, (2, in_planes, hw, hw), jnp.float32)  # NCHW
        params = init_bottleneck_params(k_param, in_planes, planes, stride)
        for cdt, tol in dtypes:
            out = bottleneck_forward(params, x, stride=stride,
                                     compute_dtype=cdt, block_m=256)
            out = jax.block_until_ready(out)
            ref = bottleneck_reference(params, x, stride=stride,
                                       compute_dtype=cdt)
            np.testing.assert_allclose(
                np.asarray(out.astype(jnp.float32)),
                np.asarray(ref.astype(jnp.float32)),
                rtol=tol, atol=tol)

    print("KERNEL_OK")
</pallas_src>

<mosaic_0001>
module attributes {stable_mosaic.version = 11 : i64} {
  func.func @_pointwise_kernel(%arg0: i32, %arg1: memref<256x4xf32, #tpu.memory_space<vmem>>, %arg2: memref<4x4xf32, #tpu.memory_space<vmem>>, %arg3: memref<1x4xf32, #tpu.memory_space<vmem>>, %arg4: memref<256x4xf32, #tpu.memory_space<vmem>>) attributes {dimension_semantics = [#tpu.dimension_semantics<parallel>], iteration_bounds = array<i64: 2>, scalar_prefetch = 0 : i64, scratch_operands = 0 : i64, tpu.core_type = #tpu.core_type<tc>, window_params = [{transform_indices = @transform_0, window_bounds = array<i64: 256, 4>}, {pipeline_mode = #tpu.pipeline_mode<synchronous>, transform_indices = @transform_1, window_bounds = array<i64: 4, 4>}, {pipeline_mode = #tpu.pipeline_mode<synchronous>, transform_indices = @transform_2, window_bounds = array<i64: 1, 4>}, {transform_indices = @transform_3, window_bounds = array<i64: 256, 4>}]} {
    %c0 = arith.constant 0 : index
    %c0_0 = arith.constant 0 : index
    %0 = vector.load %arg1[%c0, %c0_0] : memref<256x4xf32, #tpu.memory_space<vmem>>, vector<256x4xf32>
    %c0_1 = arith.constant 0 : index
    %c0_2 = arith.constant 0 : index
    %1 = vector.load %arg2[%c0_1, %c0_2] : memref<4x4xf32, #tpu.memory_space<vmem>>, vector<4x4xf32>
    %cst = arith.constant dense<0.000000e+00> : vector<256x4xf32>
    %2 = tpu.matmul %0, %1, %cst {dimension_numbers = #tpu.dot_dimension_numbers<[1], [0], [0], [1], [0, 0, 1, 1], [], []>} : vector<256x4xf32>, vector<4x4xf32>, vector<256x4xf32> -> vector<256x4xf32>
    %c0_3 = arith.constant 0 : index
    %c0_4 = arith.constant 0 : index
    %3 = vector.load %arg3[%c0_3, %c0_4] : memref<1x4xf32, #tpu.memory_space<vmem>>, vector<1x4xf32>
    %4 = vector.broadcast %3 : vector<1x4xf32> to vector<256x4xf32>
    %5 = arith.addf %2, %4 : vector<256x4xf32>
    %cst_5 = arith.constant 0.000000e+00 : f32
    %6 = vector.broadcast %cst_5 : f32 to vector<256x4xf32>
    %7 = arith.maximumf %5, %6 : vector<256x4xf32>
    %c0_6 = arith.constant 0 : index
    %c0_7 = arith.constant 0 : index
    %8 = vector.load %arg4[%c0_6, %c0_7] : memref<256x4xf32, #tpu.memory_space<vmem>>, vector<256x4xf32>
    tpu.vector_store %arg4[%c0_6, %c0_7], %7 {strides = array<i32>} : memref<256x4xf32, #tpu.memory_space<vmem>>, vector<256x4xf32>,
    return
  }
  func.func @transform_0(%arg0: i32) -> (i32, i32) {
    %c0_i32 = arith.constant 0 : i32
    %c0_i32_0 = arith.constant 0 : i32
    return %arg0, %c0_i32 : i32, i32
  }
  func.func @transform_1(%arg0: i32) -> (i32, i32) {
    %c0_i32 = arith.constant 0 : i32
    %c0_i32_0 = arith.constant 0 : i32
    %c0_i32_1 = arith.constant 0 : i32
    return %c0_i32, %c0_i32_0 : i32, i32
  }
  func.func @transform_2(%arg0: i32) -> (i32, i32) {
    %c0_i32 = arith.constant 0 : i32
    %c0_i32_0 = arith.constant 0 : i32
    %c0_i32_1 = arith.constant 0 : i32
    return %c0_i32, %c0_i32_0 : i32, i32
  }
  func.func @transform_3(%arg0: i32) -> (i32, i32) {
    %c0_i32 = arith.constant 0 : i32
    %c0_i32_0 = arith.constant 0 : i32
    return %arg0, %c0_i32 : i32, i32
  }
}

</mosaic_0001>

<bundles_post_ra>
// kernel: tpu_custom_call.1
= control target key start
LH: loop header
LB: loop body
LE: loop exit
PB: predicated region body
PF: predicated region fallthrough
CT: control target
= control target key end

     0   :  { %s629_s12 = smov 0   ;;  %s825_s0 = inlined_call_operand.vmem [shape: f32[512,4], index: 0, kind: input, shape index: {}]   ;;  %s826_s1 = inlined_call_operand.vmem [shape: f32[4,4], index: 1, kind: input, shape index: {}]   ;;  %s827_s2 = inlined_call_operand.vmem [shape: f32[1,4], index: 2, kind: input, shape index: {}]   ;;  %s828_s3 = inlined_call_operand.vmem [shape: f32[512,4], index: 3, kind: output, shape index: {}]  }
   0x1 LB: > { %s545_s13 = sadd.s32 4294967295, %s607_s12   ;;  %p549_p0 = scmp.ge.s32.totalorder %s607_s12, 1  ;;  %s607_s12 = sphi %s629_s12, %s13_s12  }
   0x2   : > { %p138_p1 = scmp.lt.s32.totalorder %s607_s12, 3 }
   0x4   : > { %p139_p2 = pnand %p549_p0, %p138_p1 }
   0x5   : > { %s550_s16 = sshll.u32 (!%p139_p2), %s545_s13, 5 }
   0x6   : > { %142 = sbr.rel (%p139_p2) target bundleno = 209 (0xd1), region = 32  ;;  %p163_p3 = scmp.lt.s32.totalorder (!%p139_p2), %s550_s16, 63 }
   0xb   : > { %v206_v0 = vld [vmem:[%s826_s1] sm:$0xf]  ;;  %vm308_vm0 = vcmask 1043456   ;;  %s830_s16 = smov (!%p163_p3, %s550_s16), 63  ;;  %vm211_vm1 = vcmask 31744  }
   0xc   : > { %590 = vmatpush.msk.msra.mxu2 %vm308_vm0, %v206_v0  ;;  %591 = vmatpush.msk.msra.mxu3 %vm308_vm0, %v206_v0  ;;  %s551_s17 = sshll.u32 %s830_s16, 3  ;;  %v717_v33 = vld [vmem:[%s827_s2] ss:$0 sm:$0xff] }
   0xd   : > { %554 = vmatpush.msk.msra.mxu0 %vm308_vm0, %v206_v0  ;;  %589 = vmatpush.msk.msra.mxu1 %vm308_vm0, %v206_v0  ;;  %s648_s20 = scalar_lea.vmem %s825_s0, %s551_s17  ;;  %s726_s25 = scalar_lea.vmem %s828_s3, %s551_s17 }
   0xe   : > { %v190_v1 = vld [vmem:[%s648_s20 + $0x80] sm:$0xff]  ;;  %v191_v5 = vld [vmem:[%s648_s20 + $0x88] sm:$0xff]  ;;  %v192_v9 = vld [vmem:[%s648_s20 + $0x90] sm:$0xff] }
   0xf   : > { %v198_v2 = vld [vmem:[%s648_s20 + $0xc0] sm:$0xff]  ;;  %571 = vmatmul.msk.f32.vlgmr.msra.gmra.mxu2 %vm211_vm1, %v190_v1  ;;  %v199_v6 = vld [vmem:[%s648_s20 + $0xc8] sm:$0xff]  ;;  %v200_v10 = vld [vmem:[%s648_s20 + $0xd0] sm:$0xff] }
  0x10   : > { %v174_v3 = vld [vmem:[%s648_s20] sm:$0xff]  ;;  %579 = vmatmul.msk.f32.vlgmr.msra.gmra.mxu3 %vm211_vm1, %v198_v2  ;;  %v175_v7 = vld [vmem:[%s648_s20 + $0x8] sm:$0xff]  ;;  %v176_v11 = vld [vmem:[%s648_s20 + $0x10] sm:$0xff] }
  0x11   : > { %v182_v4 = vld [vmem:[%s648_s20 + $0x40] sm:$0xff]  ;;  %555 = vmatmul.msk.f32.vlgmr.msra.gmra.mxu0 %vm211_vm1, %v174_v3  ;;  %v183_v8 = vld [vmem:[%s648_s20 + $0x48] sm:$0xff]  ;;  %v184_v12 = vld [vmem:[%s648_s20 + $0x50] sm:$0xff] }
  0x12   : > { %563 = vmatmul.msk.f32.vlgmr.msra.gmra.mxu1 %vm211_vm1, %v182_v4  ;;  %v193_v13 = vld [vmem:[%s648_s20 + $0x98] sm:$0xff]  ;;  %v194_v17 = vld [vmem:[%s648_s20 + $0xa0] sm:$0xff]  ;;  %v195_v21 = vld [vmem:[%s648_s20 + $0xa8] sm:$0xff] }
  0x13   : > { %v201_v14 = vld [vmem:[%s648_s20 + $0xd8] sm:$0xff]  ;;  %v202_v18 = vld [vmem:[%s648_s20 + $0xe0] sm:$0xff]  ;;  %v203_v22 = vld [vmem:[%s648_s20 + $0xe8] sm:$0xff] }
  0x14   : > { %v177_v15 = vld [vmem:[%s648_s20 + $0x18] sm:$0xff]  ;;  %v178_v19 = vld [vmem:[%s648_s20 + $0x20] sm:$0xff]  ;;  %v179_v23 = vld [vmem:[%s648_s20 + $0x28] sm:$0xff] }
  0x15   : > { %v185_v16 = vld [vmem:[%s648_s20 + $0x58] sm:$0xff]  ;;  %v186_v20 = vld [vmem:[%s648_s20 + $0x60] sm:$0xff]  ;;  %v187_v24 = vld [vmem:[%s648_s20 + $0x68] sm:$0xff] }
  0x16   : > { %v196_v25 = vld [vmem:[%s648_s20 + $0xb0] sm:$0xff]  ;;  %v197_v29 = vld [vmem:[%s648_s20 + $0xb8] sm:$0xff] }
  0x17   : > { %572 = vmatmul.msk.f32.gmra.mxu2 %vm211_vm1, %v191_v5  ;;  %v204_v26 = vld [vmem:[%s648_s20 + $0xf0] sm:$0xff]  ;;  %v205_v30 = vld [vmem:[%s648_s20 + $0xf8] sm:$0xff] }
  0x18   : > { %580 = vmatmul.msk.f32.gmra.mxu3 %vm211_vm1, %v199_v6  ;;  %v180_v27 = vld [vmem:[%s648_s20 + $0x30] sm:$0xff]  ;;  %v181_v31 = vld [vmem:[%s648_s20 + $0x38] sm:$0xff] }
  0x19   : > { %556 = vmatmul.msk.f32.gmra.mxu0 %vm211_vm1, %v175_v7  ;;  %v188_v28 = vld [vmem:[%s648_s20 + $0x70] sm:$0xff]  ;;  %v189_v32 = vld [vmem:[%s648_s20 + $0x78] sm:$0xff] }
  0x1a   : > { %564 = vmatmul.msk.f32.gmra.mxu1 %vm211_vm1, %v183_v8 }
  0x1f   : > { %573 = vmatmul.msk.f32.gmra.mxu2 %vm211_vm1, %v192_v9 }
  0x20   : > { %581 = vmatmul.msk.f32.gmra.mxu3 %vm211_vm1, %v200_v10 }
  0x21   : > { %557 = vmatmul.msk.f32.gmra.mxu0 %vm211_vm1, %v176_v11 }
  0x22   : > { %565 = vmatmul.msk.f32.gmra.mxu1 %vm211_vm1, %v184_v12 }
  0x27   : > { %574 = vmatmul.msk.f32.gmra.mxu2 %vm211_vm1, %v193_v13 }
  0x28   : > { %582 = vmatmul.msk.f32.gmra.mxu3 %vm211_vm1, %v201_v14 }
  0x29   : > { %558 = vmatmul.msk.f32.gmra.mxu0 %vm211_vm1, %v177_v15 }
  0x2a   : > { %566 = vmatmul.msk.f32.gmra.mxu1 %vm211_vm1, %v185_v16 }
  0x2f   : > { %575 = vmatmul.msk.f32.gmra.mxu2 %vm211_vm1, %v194_v17 }
  0x30   : > { %583 = vmatmul.msk.f32.gmra.mxu3 %vm211_vm1, %v202_v18 }
  0x31   : > { %559 = vmatmul.msk.f32.gmra.mxu0 %vm211_vm1, %v178_v19 }
  0x32   : > { %567 = vmatmul.msk.f32.gmra.mxu1 %vm211_vm1, %v186_v20 }
  0x37   : > { %576 = vmatmul.msk.f32.gmra.mxu2 %vm211_vm1, %v195_v21 }
  0x38   : > { %584 = vmatmul.msk.f32.gmra.mxu3 %vm211_vm1, %v203_v22 }
  0x39   : > { %560 = vmatmul.msk.f32.gmra.mxu0 %vm211_vm1, %v179_v23 }
  0x3a   : > { %568 = vmatmul.msk.f32.gmra.mxu1 %vm211_vm1, %v187_v24 }
  0x3f   : > { %577 = vmatmul.msk.f32.gmra.mxu2 %vm211_vm1, %v196_v25 }
  0x40   : > { %585 = vmatmul.msk.f32.gmra.mxu3 %vm211_vm1, %v204_v26 }
  0x41   : > { %561 = vmatmul.msk.f32.gmra.mxu0 %vm211_vm1, %v180_v27 }
  0x42   : > { %569 = vmatmul.msk.f32.gmra.mxu1 %vm211_vm1, %v188_v28 }
  0x47   : > { %578 = vmatmul.msk.f32.gmra.mxu2 %vm211_vm1, %v197_v29 }
  0x48   : > { %586 = vmatmul.msk.f32.gmra.mxu3 %vm211_vm1, %v205_v30 }
  0x49   : > { %562 = vmatmul.msk.f32.gmra.mxu0 %vm211_vm1, %v181_v31 }
  0x4a   : > { %570 = vmatmul.msk.f32.gmra.mxu1 %vm211_vm1, %v189_v32 }
  0x8e   : > { %v329_v34 = vpop.f32.mrf.mxu0 }
  0x8f   : > { %v353_v35 = vpop.f32.mrf.mxu1  ;;  %v330_v36 = vadd.f32 %v717_v33, %v329_v34 }
  0x90   : > { %v354_v37 = vadd.f32 %v717_v33, %v353_v35 }
  0x91   : > { %v425_v38 = vmax.f32 %v330_v36, 0.0 }
  0x92   : > { %v433_v39 = vmax.f32 %v354_v37, 0.0  ;;  %v377_v40 = vpop.f32.mrf.mxu2 }
  0x93   : > { %457 = vst.msk [vmem:[%s726_s25] sm:$0xff] %vm211_vm1, %v425_v38  ;;  %v401_v41 = vpop.f32.mrf.mxu3  ;;  %v378_v42 = vadd.f32 %v717_v33, %v377_v40 }
  0x94   : > { %465 = vst.msk [vmem:[%s726_s25 + $0x40] sm:$0xff] %vm211_vm1, %v433_v39  ;;  %v402_v43 = vadd.f32 %v717_v33, %v401_v41 }
  0x95   : > { %v441_v44 = vmax.f32 %v378_v42, 0.0 }
  0x96   : > { %v449_v45 = vmax.f32 %v402_v43, 0.0  ;;  %v332_v46 = vpop.f32.mrf.mxu0 }
  0x97   : > { %v356_v47 = vpop.f32.mrf.mxu1  ;;  %v333_v48 = vadd.f32 %v717_v33, %v332_v46  ;;  %473 = vst.msk [vmem:[%s726_s25 + $0x80] sm:$0xff] %vm211_vm1, %v441_v44 }
  0x98   : > { %v357_v49 = vadd.f32 %v717_v33, %v356_v47  ;;  %481 = vst.msk [vmem:[%s726_s25 + $0xc0] sm:$0xff] %vm211_vm1, %v449_v45 }
  0x99   : > { %v426_v50 = vmax.f32 %v333_v48, 0.0 }
  0x9a   : > { %v434_v51 = vmax.f32 %v357_v49, 0.0  ;;  %v380_v52 = vpop.f32.mrf.mxu2 }
  0x9b   : > { %458 = vst.msk [vmem:[%s726_s25 + $0x8] sm:$0xff] %vm211_vm1, %v426_v50  ;;  %v404_v53 = vpop.f32.mrf.mxu3  ;;  %v381_v54 = vadd.f32 %v717_v33, %v380_v52 }
  0x9c   : > { %466 = vst.msk [vmem:[%s726_s25 + $0x48] sm:$0xff] %vm211_vm1, %v434_v51  ;;  %v405_v55 = vadd.f32 %v717_v33, %v404_v53 }
  0x9d   : > { %v442_v56 = vmax.f32 %v381_v54, 0.0 }
  0x9e   : > { %v450_v57 = vmax.f32 %v405_v55, 0.0  ;;  %v335_v58 = vpop.f32.mrf.mxu0 }
  0x9f   : > { %v359_v59 = vpop.f32.mrf.mxu1  ;;  %v336_v60 = vadd.f32 %v717_v33, %v335_v58  ;;  %474 = vst.msk [vmem:[%s726_s25 + $0x88] sm:$0xff] %vm211_vm1, %v442_v56 }
  0xa0   : > { %v360_v61 = vadd.f32 %v717_v33, %v359_v59  ;;  %482 = vst.msk [vmem:[%s726_s25 + $0xc8] sm:$0xff] %vm211_vm1, %v450_v57 }
  0xa1   : > { %v427_v62 = vmax.f32 %v336_v60, 0.0 }
  0xa2   : > { %v435_v63 = vmax.f32 %v360_v61, 0.0  ;;  %v383_v0 = vpop.f32.mrf.mxu2 }
  0xa3   : > { %459 = vst.msk [vmem:[%s726_s25 + $0x10] sm:$0xff] %vm211_vm1, %v427_v62  ;;  %v407_v1 = vpop.f32.mrf.mxu3  ;;  %v384_v2 = vadd.f32 %v717_v33, %v383_v0 }
  0xa4   : > { %467 = vst.msk [vmem:[%s726_s25 + $0x50] sm:$0xff] %vm211_vm1, %v435_v63  ;;  %v408_v3 = vadd.f32 %v717_v33, %v407_v1 }
  0xa5   : > { %v443_v4 = vmax.f32 %v384_v2, 0.0 }
  0xa6   : > { %v451_v5 = vmax.f32 %v408_v3, 0.0  ;;  %v338_v6 = vpop.f32.mrf.mxu0 }
  0xa7   : > { %v362_v7 = vpop.f32.mrf.mxu1  ;;  %v339_v8 = vadd.f32 %v717_v33, %v338_v6  ;;  %475 = vst.msk [vmem:[%s726_s25 + $0x90] sm:$0xff] %vm211_vm1, %v443_v4 }
  0xa8   : > { %v363_v9 = vadd.f32 %v717_v33, %v362_v7  ;;  %483 = vst.msk [vmem:[%s726_s25 + $0xd0] sm:$0xff] %vm211_vm1, %v451_v5 }
  0xa9   : > { %v428_v10 = vmax.f32 %v339_v8, 0.0 }
  0xaa   : > { %v436_v11 = vmax.f32 %v363_v9, 0.0  ;;  %v386_v12 = vpop.f32.mrf.mxu2 }
  0xab   : > { %460 = vst.msk [vmem:[%s726_s25 + $0x18] sm:$0xff] %vm211_vm1, %v428_v10  ;;  %v410_v13 = vpop.f32.mrf.mxu3  ;;  %v387_v14 = vadd.f32 %v717_v33, %v386_v12 }
  0xac   : > { %468 = vst.msk [vmem:[%s726_s25 + $0x58] sm:$0xff] %vm211_vm1, %v436_v11  ;;  %v411_v15 = vadd.f32 %v717_v33, %v410_v13 }
  0xad   : > { %v444_v16 = vmax.f32 %v387_v14, 0.0 }
  0xae   : > { %v452_v17 = vmax.f32 %v411_v15, 0.0  ;;  %v341_v18 = vpop.f32.mrf.mxu0 }
  0xaf   : > { %v365_v19 = vpop.f32.mrf.mxu1  ;;  %v342_v20 = vadd.f32 %v717_v33, %v341_v18  ;;  %476 = vst.msk [vmem:[%s726_s25 + $0x98] sm:$0xff] %vm211_vm1, %v444_v16 }
  0xb0   : > { %v366_v21 = vadd.f32 %v717_v33, %v365_v19  ;;  %484 = vst.msk [vmem:[%s726_s25 + $0xd8] sm:$0xff] %vm211_vm1, %v452_v17 }
  0xb1   : > { %v429_v22 = vmax.f32 %v342_v20, 0.0 }
  0xb2   : > { %v437_v23 = vmax.f32 %v366_v21, 0.0  ;;  %v389_v24 = vpop.f32.mrf.mxu2 }
  0xb3   : > { %461 = vst.msk [vmem:[%s726_s25 + $0x20] sm:$0xff] %vm211_vm1, %v429_v22  ;;  %v413_v25 = vpop.f32.mrf.mxu3  ;;  %v390_v26 = vadd.f32 %v717_v33, %v389_v24 }
  0xb4   : > { %469 = vst.msk [vmem:[%s726_s25 + $0x60] sm:$0xff] %vm211_vm1, %v437_v23  ;;  %v414_v27 = vadd.f32 %v717_v33, %v413_v25 }
  0xb5   : > { %v445_v28 = vmax.f32 %v390_v26, 0.0 }
  0xb6   : > { %v453_v29 = vmax.f32 %v414_v27, 0.0  ;;  %v344_v30 = vpop.f32.mrf.mxu0 }
  0xb7   : > { %v368_v31 = vpop.f32.mrf.mxu1  ;;  %v345_v32 = vadd.f32 %v717_v33, %v344_v30  ;;  %477 = vst.msk [vmem:[%s726_s25 + $0xa0] sm:$0xff] %vm211_vm1, %v445_v28 }
  0xb8   : > { %v369_v34 = vadd.f32 %v717_v33, %v368_v31  ;;  %485 = vst.msk [vmem:[%s726_s25 + $0xe0] sm:$0xff] %vm211_vm1, %v453_v29 }
  0xb9   : > { %v430_v35 = vmax.f32 %v345_v32, 0.0 }
  0xba   : > { %v438_v36 = vmax.f32 %v369_v34, 0.0  ;;  %v392_v37 = vpop.f32.mrf.mxu2 }
  0xbb   : > { %462 = vst.msk [vmem:[%s726_s25 + $0x28] sm:$0xff] %vm211_vm1, %v430_v35  ;;  %v416_v38 = vpop.f32.mrf.mxu3  ;;  %v393_v39 = vadd.f32 %v717_v33, %v392_v37 }
  0xbc   : > { %470 = vst.msk [vmem:[%s726_s25 + $0x68] sm:$0xff] %vm211_vm1, %v438_v36  ;;  %v417_v40 = vadd.f32 %v717_v33, %v416_v38 }
  0xbd   : > { %v446_v41 = vmax.f32 %v393_v39, 0.0 }
  0xbe   : > { %v454_v42 = vmax.f32 %v417_v40, 0.0  ;;  %v347_v43 = vpop.f32.mrf.mxu0 }
  0xbf   : > { %v371_v44 = vpop.f32.mrf.mxu1  ;;  %v348_v45 = vadd.f32 %v717_v33, %v347_v43  ;;  %478 = vst.msk [vmem:[%s726_s25 + $0xa8] sm:$0xff] %vm211_vm1, %v446_v41 }
  0xc0   : > { %v372_v46 = vadd.f32 %v717_v33, %v371_v44  ;;  %486 = vst.msk [vmem:[%s726_s25 + $0xe8] sm:$0xff] %vm211_vm1, %v454_v42 }
  0xc1   : > { %v431_v47 = vmax.f32 %v348_v45, 0.0 }
  0xc2   : > { %v439_v48 = vmax.f32 %v372_v46, 0.0  ;;  %v395_v49 = vpop.f32.mrf.mxu2 }
  0xc3   : > { %463 = vst.msk [vmem:[%s726_s25 + $0x30] sm:$0xff] %vm211_vm1, %v431_v47  ;;  %v419_v50 = vpop.f32.mrf.mxu3  ;;  %v396_v51 = vadd.f32 %v717_v33, %v395_v49 }
  0xc4   : > { %471 = vst.msk [vmem:[%s726_s25 + $0x70] sm:$0xff] %vm211_vm1, %v439_v48  ;;  %v420_v52 = vadd.f32 %v717_v33, %v419_v50 }
  0xc5   : > { %v447_v53 = vmax.f32 %v396_v51, 0.0 }
  0xc6   : > { %v455_v54 = vmax.f32 %v420_v52, 0.0  ;;  %v350_v55 = vpop.f32.mrf.mxu0 }
  0xc7   : > { %v374_v56 = vpop.f32.mrf.mxu1  ;;  %v351_v57 = vadd.f32 %v717_v33, %v350_v55  ;;  %479 = vst.msk [vmem:[%s726_s25 + $0xb0] sm:$0xff] %vm211_vm1, %v447_v53 }
  0xc8   : > { %v375_v58 = vadd.f32 %v717_v33, %v374_v56  ;;  %487 = vst.msk [vmem:[%s726_s25 + $0xf0] sm:$0xff] %vm211_vm1, %v455_v54 }
  0xc9   : > { %v432_v59 = vmax.f32 %v351_v57, 0.0 }
  0xca   : > { %v440_v60 = vmax.f32 %v375_v58, 0.0  ;;  %v398_v61 = vpop.f32.mrf.mxu2 }
  0xcb   : > { %464 = vst.msk [vmem:[%s726_s25 + $0x38] sm:$0xff] %vm211_vm1, %v432_v59  ;;  %v422_v62 = vpop.f32.mrf.mxu3  ;;  %v399_v63 = vadd.f32 %v717_v33, %v398_v61 }
  0xcc   : > { %472 = vst.msk [vmem:[%s726_s25 + $0x78] sm:$0xff] %vm211_vm1, %v440_v60  ;;  %v423_v0 = vadd.f32 %v717_v33, %v422_v62 }
  0xcd   : > { %v448_v1 = vmax.f32 %v399_v63, 0.0 }
  0xce   : > { %v456_v2 = vmax.f32 %v423_v0, 0.0 }
  0xcf   : > { %480 = vst.msk [vmem:[%s726_s25 + $0xb8] sm:$0xff] %vm211_vm1, %v448_v1 }
  0xd0   : > { %488 = vst.msk [vmem:[%s726_s25 + $0xf8] sm:$0xff] %vm211_vm1, %v456_v2 }
  0xd1 PF: > { %s13_s12 = sadd.s32 1, %s607_s12  }
  0xd2   : > { %p10_p4 = scmp.ge.s32.totalorder %s13_s12, 4  }
  0xd4   :  { %12 = sbr.rel (!%p10_p4) target bundleno = 1 (0x1), region = 62 }

</bundles_post_ra>
